<compile_context>
chip_gen: v7x
topology: tpu7x:2x2x1
jax: 0.10.0
libtpu: 0.0.40
codegen_flags: <defaults>
</compile_context>

<pallas_src>
import functools
import math

import jax
import jax.numpy as jnp
from jax import lax
from jax.experimental import pallas as pl
from jax.experimental.pallas import tpu as pltpu

_MIB = 1024 * 1024


def _round_up(n, m):
    return ((n + m - 1) // m) * m


def _cdiv(a, b):
    return -(-a // b)


def _row_tiles(n, target=512):
    """Balanced row tiles: multiple of 8, <= target, minimal padding."""
    n8 = _round_up(max(n, 1), 8)
    n_tiles = _cdiv(n8, target)
    tm = _round_up(_cdiv(n8, n_tiles), 8)
    n_pad = _round_up(n8, tm)
    return tm, n_pad


@functools.lru_cache(maxsize=None)
def _vmem_limit_bytes():
    """Per-generation scoped-VMEM cap: ~3/4 of physical, clamped to [32, 96] MiB."""
    try:
        info = pltpu.get_tpu_info()
        cap = None
        for name in ("vmem_capacity_bytes", "vmem_size_bytes", "vmem_bytes"):
            cap = getattr(info, name, None)
            if cap:
                break
        if cap:
            return int(max(32 * _MIB, min(96 * _MIB, (int(cap) * 3) // 4)))
    except Exception:
        pass
    return 32 * _MIB  # conservative fallback (safe on v5e/v6e/v7x)


def _compiler_params(n_axes):
    return pltpu.CompilerParams(
        dimension_semantics=("parallel",) * n_axes,
        vmem_limit_bytes=_vmem_limit_bytes(),
    )


def _full_spec(shape):
    # Whole-array block with a constant block index: Pallas skips re-DMA across grid steps.
    # TODO(synk): on v7x mark these pipeline_mode=pl.Buffered(1) to halve resident-weight VMEM.
    return pl.BlockSpec(shape, lambda *_: (0,) * len(shape))


def _layernorm(z, g, b, eps):
    mu = jnp.mean(z, axis=-1, keepdims=True)
    d = z - mu
    var = jnp.mean(d * d, axis=-1, keepdims=True)
    return d * lax.rsqrt(var + eps) * g + b


# ---------------------------------------------------------------------------
# Pallas kernels
# ---------------------------------------------------------------------------

def _enc_pe_kernel(x_ref, w_ref, b_ref, pe_ref, o_ref, *, compute_dtype):
    """(x @ W_scaled + b_scaled) + positional_encoding, one batch element per program.
    The sqrt(d_model) scale is pre-folded into W and b host-side."""
    y = jnp.dot(x_ref[...].astype(compute_dtype),
                w_ref[...].astype(compute_dtype),
                preferred_element_type=jnp.float32)
    o_ref[...] = (y + b_ref[...] + pe_ref[...]).astype(o_ref.dtype)


def _encoder_layer_kernel(x_ref, wqkv_ref, bqkv_ref, wout_ref, bout_ref,
                          g1_ref, beta1_ref, w1_ref, b1_ref, w2_ref, b2_ref,
                          g2_ref, beta2_ref, o_ref,
                          *, nhead, dh_pad, scale, eps, compute_dtype, approx_recip):
    """One fused post-norm encoder layer per batch element:

    QKV projection (lane-padded per-head layout) -> per-head causal attention ->
    lane-dense head concat -> ONE full-width out-projection matmul -> residual + LN1 ->
    lin1 -> relu -> lin2 (nhid activation stays on-chip) -> residual + LN2.
    """
    S, D = x_ref.shape
    Hp = nhead * dh_pad

    x32 = x_ref[...].astype(jnp.float32)
    qkv = jnp.dot(x_ref[...].astype(compute_dtype),
                  wqkv_ref[...].astype(compute_dtype),
                  preferred_element_type=jnp.float32) + bqkv_ref[...]      # (S, 3*Hp) f32

    row = lax.broadcasted_iota(jnp.int32, (S, S), 0)
    col = lax.broadcasted_iota(jnp.int32, (S, S), 1)
    causal = col <= row

    pv_parts = []
    for h in range(nhead):  # small H, statically unrolled; 128-aligned lane slices
        q = qkv[:, h * dh_pad:(h + 1) * dh_pad].astype(compute_dtype)
        k = qkv[:, Hp + h * dh_pad:Hp + (h + 1) * dh_pad].astype(compute_dtype)
        v = qkv[:, 2 * Hp + h * dh_pad:2 * Hp + (h + 1) * dh_pad].astype(compute_dtype)

        s = lax.dot_general(q, k, (((1,), (1,)), ((), ())),
                            preferred_element_type=jnp.float32) * scale    # (S, S)
        s = jnp.where(causal, s, -1e30)         # large finite negative (NaN-safe mask)
        m = jnp.max(s, axis=-1, keepdims=True)
        p = jnp.exp(s - m)
        l = jnp.sum(p, axis=-1, keepdims=True)
        pv = jnp.dot(p.astype(compute_dtype), v,
                     preferred_element_type=jnp.float32)                   # (S, dh_pad)
        if approx_recip:
            pv = pv * pl.reciprocal(l, approx=True)    # normalize the small PV output
        else:
            pv = pv / l                                # exact on the strict f32 path
        pv_parts.append(pv)

    heads = jnp.concatenate(pv_parts, axis=1)                              # (S, Hp) f32
    attn = jnp.dot(heads.astype(compute_dtype),
                   wout_ref[...].astype(compute_dtype),
                   preferred_element_type=jnp.float32) + bout_ref[...]     # (S, D)

    z1 = _layernorm(x32 + attn, g1_ref[...], beta1_ref[...], eps)          # post-norm

    f = jnp.dot(z1.astype(compute_dtype),
                w1_ref[...].astype(compute_dtype),
                preferred_element_type=jnp.float32) + b1_ref[...]
    f = jnp.maximum(f, 0.0)                        # nhid activation stays on-chip
    y = jnp.dot(f.astype(compute_dtype),
                w2_ref[...].astype(compute_dtype),
                preferred_element_type=jnp.float32) + b2_ref[...]

    o_ref[...] = _layernorm(z1 + y, g2_ref[...], beta2_ref[...], eps).astype(o_ref.dtype)


def _linear_kernel(x_ref, w_ref, b_ref, o_ref, *, compute_dtype):
    y = jnp.dot(x_ref[...].astype(compute_dtype),
                w_ref[...].astype(compute_dtype),
                preferred_element_type=jnp.float32) + b_ref[...]
    o_ref[...] = y.astype(o_ref.dtype)


# ---------------------------------------------------------------------------
# Pallas wrappers
# ---------------------------------------------------------------------------

def encode_pe(src_bsd, w_t, b, pe, *, compute_dtype, act_dtype):
    """Encoder Linear (scale pre-folded) + PE.  src_bsd:(B,S,D), w_t:(D,D), pe:(S,D)."""
    B, S, D = src_bsd.shape
    x_spec = pl.BlockSpec((None, S, D), lambda bb: (bb, 0, 0))
    return pl.pallas_call(
        functools.partial(_enc_pe_kernel, compute_dtype=compute_dtype),
        out_shape=jax.ShapeDtypeStruct((B, S, D), act_dtype),
        grid=(B,),
        in_specs=[x_spec, _full_spec((D, D)), _full_spec((1, D)), _full_spec((S, D))],
        out_specs=x_spec,
        compiler_params=_compiler_params(1),
    )(src_bsd, w_t, b.reshape(1, -1), pe)


def encoder_layer(h, wqkv_pad, bqkv_pad, wout_pad, bout, g1, beta1,
                  w1_t, b1, w2_t, b2, g2, beta2,
                  *, nhead, dh, dh_pad, eps=1e-5, compute_dtype=jnp.float32):
    """One fused encoder layer.  h:(B,S,D) -> (B,S,D), grid over batch."""
    B, S, D = h.shape
    nhid = w1_t.shape[1]
    Hp = nhead * dh_pad
    x_spec = pl.BlockSpec((None, S, D), lambda bb: (bb, 0, 0))
    return pl.pallas_call(
        functools.partial(_encoder_layer_kernel, nhead=nhead, dh_pad=dh_pad,
                          scale=1.0 / math.sqrt(dh), eps=eps,
                          compute_dtype=compute_dtype,
                          approx_recip=(compute_dtype != jnp.float32)),
        out_shape=jax.ShapeDtypeStruct((B, S, D), h.dtype),
        grid=(B,),
        in_specs=[x_spec,
                  _full_spec((D, 3 * Hp)), _full_spec((1, 3 * Hp)),
                  _full_spec((Hp, D)), _full_spec((1, D)),
                  _full_spec((1, D)), _full_spec((1, D)),
                  _full_spec((D, nhid)), _full_spec((1, nhid)),
                  _full_spec((nhid, D)), _full_spec((1, D)),
                  _full_spec((1, D)), _full_spec((1, D))],
        out_specs=x_spec,
        compiler_params=_compiler_params(1),
    )(h, wqkv_pad, bqkv_pad.reshape(1, -1), wout_pad, bout.reshape(1, -1),
      g1.reshape(1, -1), beta1.reshape(1, -1),
      w1_t, b1.reshape(1, -1), w2_t, b2.reshape(1, -1),
      g2.reshape(1, -1), beta2.reshape(1, -1))


def linear_rows(x, w_t, b, *, compute_dtype=jnp.float32, out_dtype=jnp.float32,
                tm_target=512):
    """y = x @ w_t + b, row-tiled grid, lane-dense (>=128-wide) output stores."""
    N, D = x.shape
    dout = w_t.shape[1]
    dout_pad = _round_up(dout, 128)
    if dout_pad != dout:   # lane-dense stores; slice back on host
        w_t = jnp.pad(w_t, ((0, 0), (0, dout_pad - dout)))
        b = jnp.pad(b, (0, dout_pad - dout))
    tm, n_pad = _row_tiles(N, tm_target)
    if n_pad != N:
        x = jnp.pad(x, ((0, n_pad - N), (0, 0)))
    x_spec = pl.BlockSpec((tm, D), lambda i: (i, 0))
    o_spec = pl.BlockSpec((tm, dout_pad), lambda i: (i, 0))
    out = pl.pallas_call(
        functools.partial(_linear_kernel, compute_dtype=compute_dtype),
        out_shape=jax.ShapeDtypeStruct((n_pad, dout_pad), out_dtype),
        grid=(n_pad // tm,),
        in_specs=[x_spec, _full_spec((D, dout_pad)), _full_spec((1, dout_pad))],
        out_specs=o_spec,
        compiler_params=_compiler_params(1),
    )(x, w_t, b.reshape(1, -1))
    return out[:N, :dout]


# ---------------------------------------------------------------------------
# Host-side weight re-layout (lane-dense per-head padding)
# ---------------------------------------------------------------------------

def _pad_qkv(in_proj_w, in_proj_b, nhead, dh, dh_pad):
    """(3D, D) PyTorch in_proj -> (D, 3*H*dh_pad) weight + (3*H*dh_pad,) bias, zero-padded
    so each head's Q/K/V slice is a 128-lane-aligned, dh_pad-wide block."""
    D = in_proj_w.shape[1]
    w_t = in_proj_w.T                                    # (D, 3D): [Q | K | V] columns
    Hp = nhead * dh_pad
    w_pad = jnp.zeros((D, 3 * Hp), w_t.dtype)
    b_pad = jnp.zeros((3 * Hp,), in_proj_b.dtype)
    for t in range(3):
        for h in range(nhead):
            src = t * D + h * dh
            dst = t * Hp + h * dh_pad
            w_pad = w_pad.at[:, dst:dst + dh].set(w_t[:, src:src + dh])
            b_pad = b_pad.at[dst:dst + dh].set(in_proj_b[src:src + dh])
    return w_pad, b_pad


def _pad_out_proj(out_proj_w, nhead, dh, dh_pad):
    """(D, D) out_proj -> (H*dh_pad, D) with zero rows in the padded head slots, so the
    out-projection is one full-width matmul against the lane-dense concat of head outputs."""
    w_t = out_proj_w.T                                   # rows = concat-head features
    D = w_t.shape[1]
    Hp = nhead * dh_pad
    w_pad = jnp.zeros((Hp, D), w_t.dtype)
    for h in range(nhead):
        w_pad = w_pad.at[h * dh_pad:h * dh_pad + dh, :].set(w_t[h * dh:(h + 1) * dh, :])
    return w_pad


# ---------------------------------------------------------------------------
# Parameters / positional encoding (plain JAX glue)
# ---------------------------------------------------------------------------

def positional_encoding(S, d_model):
    position = jnp.arange(S, dtype=jnp.float32)[:, None]
    div_term = jnp.exp(jnp.arange(0, d_model, 2, dtype=jnp.float32)
                       * (-math.log(10000.0) / d_model))
    ang = position * div_term[None, :]
    pe = jnp.zeros((S, d_model), jnp.float32)
    pe = pe.at[:, 0::2].set(jnp.sin(ang))
    pe = pe.at[:, 1::2].set(jnp.cos(ang))
    return pe


def init_params(key, d_model, out_size, nhid, nlayers):
    initrange = 0.1
    keys = jax.random.split(key, 2 + nlayers)

    def xavier(k, shape):
        fan_out, fan_in = shape
        lim = math.sqrt(6.0 / (fan_in + fan_out))
        return jax.random.uniform(k, shape, jnp.float32, -lim, lim)

    params = dict(
        enc_w=jax.random.uniform(keys[0], (d_model, d_model), jnp.float32,
                                 -initrange, initrange),
        enc_b=jnp.zeros((d_model,), jnp.float32),
        dec_w=jax.random.uniform(keys[1], (out_size, d_model), jnp.float32,
                                 -initrange, initrange),
        dec_b=jnp.zeros((out_size,), jnp.float32),
        layers=[],
    )
    for l in range(nlayers):
        ks = jax.random.split(keys[2 + l], 4)
        params["layers"].append(dict(
            in_proj_w=xavier(ks[0], (3 * d_model, d_model)),
            in_proj_b=jnp.zeros((3 * d_model,), jnp.float32),
            out_proj_w=xavier(ks[1], (d_model, d_model)),
            out_proj_b=jnp.zeros((d_model,), jnp.float32),
            lin1_w=xavier(ks[2], (nhid, d_model)),
            lin1_b=jnp.zeros((nhid,), jnp.float32),
            lin2_w=xavier(ks[3], (d_model, nhid)),
            lin2_b=jnp.zeros((d_model,), jnp.float32),
            ln1_g=jnp.ones((d_model,), jnp.float32),
            ln1_b=jnp.zeros((d_model,), jnp.float32),
            ln2_g=jnp.ones((d_model,), jnp.float32),
            ln2_b=jnp.zeros((d_model,), jnp.float32),
        ))
    return params


def cast_matmul_weights(params, dtype):
    """Cast matmul weight matrices to `dtype` (biases / LN params stay f32)."""
    p = dict(params)
    p["enc_w"] = params["enc_w"].astype(dtype)
    p["dec_w"] = params["dec_w"].astype(dtype)
    layers = []
    for lp in params["layers"]:
        lp2 = dict(lp)
        for k in ("in_proj_w", "out_proj_w", "lin1_w", "lin2_w"):
            lp2[k] = lp[k].astype(dtype)
        layers.append(lp2)
    p["layers"] = layers
    return p


# ---------------------------------------------------------------------------
# Forward pass (Pallas kernels + thin JAX glue)
# ---------------------------------------------------------------------------

def transformer_forward(params, src, nhead, *, compute_dtype=jnp.float32):
    # src: (S, B, D) -- PyTorch seq-first convention. Internally we use batch-major
    # (B, S, D) so each program gets a contiguous, lane-dense (S, D) slab.
    S, B, D = src.shape
    dh = D // nhead
    dh_pad = _round_up(dh, 128)          # lane-dense per-head Q/K/V slots
    act_dtype = compute_dtype            # inter-kernel activations stay bf16 on the fast path
    x = jnp.transpose(src, (1, 0, 2))                        # (B, S, D)
    pe = positional_encoding(S, D)                           # (S, D), passed once

    # Fold sqrt(d_model) into the encoder weight/bias host-side.
    scale = math.sqrt(D)
    enc_w = (params["enc_w"].astype(jnp.float32) * scale).astype(params["enc_w"].dtype)
    enc_b = params["enc_b"] * scale

    h = encode_pe(x, enc_w.T, enc_b, pe,
                  compute_dtype=compute_dtype, act_dtype=act_dtype)        # (B, S, D)

    for lp in params["layers"]:
        wqkv_pad, bqkv_pad = _pad_qkv(lp["in_proj_w"], lp["in_proj_b"], nhead, dh, dh_pad)
        wout_pad = _pad_out_proj(lp["out_proj_w"], nhead, dh, dh_pad)
        # One fused kernel per layer: QKV + causal MHA + out-proj + LN1 + FFN + LN2.
        h = encoder_layer(h, wqkv_pad, bqkv_pad, wout_pad, lp["out_proj_b"],
                          lp["ln1_g"], lp["ln1_b"],
                          lp["lin1_w"].T, lp["lin1_b"],
                          lp["lin2_w"].T, lp["lin2_b"],
                          lp["ln2_g"], lp["ln2_b"],
                          nhead=nhead, dh=dh, dh_pad=dh_pad,
                          compute_dtype=compute_dtype)

    out = linear_rows(h.reshape(B * S, D), params["dec_w"].T, params["dec_b"],
                      compute_dtype=compute_dtype, out_dtype=jnp.float32)
    return jnp.transpose(out.reshape(B, S, -1), (1, 0, 2))   # back to (S, B, out)


# ---------------------------------------------------------------------------
# Pure-JAX reference for verification
# ---------------------------------------------------------------------------

def _ln_ref(x, g, b, eps=1e-5):
    mu = x.mean(-1, keepdims=True)
    var = ((x - mu) ** 2).mean(-1, keepdims=True)
    return (x - mu) * lax.rsqrt(var + eps) * g + b


def ref_forward(params, src, nhead):
    S, B, D = src.shape
    H, dh = nhead, D // nhead
    h = (jnp.einsum("sbd,ed->sbe", src, params["enc_w"]) + params["enc_b"]) * math.sqrt(D)
    h = h + positional_encoding(S, D)[:, None, :]
    mask = jnp.where(jnp.arange(S)[None, :] <= jnp.arange(S)[:, None], 0.0, -jnp.inf)
    for lp in params["layers"]:
        qkv = jnp.einsum("sbd,ed->sbe", h, lp["in_proj_w"]) + lp["in_proj_b"]
        q, k, v = jnp.split(qkv, 3, axis=-1)
        heads = lambda t: t.reshape(S, B, H, dh).transpose(1, 2, 0, 3)
        sc = jnp.einsum("bhqd,bhkd->bhqk", heads(q), heads(k)) / math.sqrt(dh) + mask
        p = jax.nn.softmax(sc, axis=-1)
        o = jnp.einsum("bhqk,bhkd->bhqd", p, heads(v)).transpose(2, 0, 1, 3).reshape(S, B, D)
        attn = jnp.einsum("sbd,ed->sbe", o, lp["out_proj_w"]) + lp["out_proj_b"]
        h = _ln_ref(h + attn, lp["ln1_g"], lp["ln1_b"])
        f = jax.nn.relu(jnp.einsum("sbd,fd->sbf", h, lp["lin1_w"]) + lp["lin1_b"])
        f = jnp.einsum("sbf,df->sbd", f, lp["lin2_w"]) + lp["lin2_b"]
        h = _ln_ref(h + f, lp["ln2_g"], lp["ln2_b"])
    return jnp.einsum("sbd,od->sbo", h, params["dec_w"]) + params["dec_b"]


# ---------------------------------------------------------------------------

if __name__ == "__main__":
    # Small shapes consistent with the module: d_model=32, nhead=4, nhid=64, nlayers=2
    S, B = 8, 2
    d_model, nhead, nhid, nlayers, output_size = 32, 4, 64, 2, 8

    key = jax.random.PRNGKey(0)
    pkey, xkey = jax.random.split(key)
    params = init_params(pkey, d_model, output_size, nhid, nlayers)
    src = jax.random.normal(xkey, (S, B, d_model), jnp.float32)

    # f32 compute path: strict check against the pure-JAX reference
    out = jax.block_until_ready(transformer_forward(params, src, nhead))
    assert out.shape == (S, B, output_size)
    ref = jax.block_until_ready(ref_forward(params, src, nhead))
    assert jnp.allclose(out, ref, rtol=5e-3, atol=5e-3), \
        f"f32 max abs err {float(jnp.max(jnp.abs(out - ref)))}"

    # bf16 MXU path (weights cast to bf16, f32 accumulation): lenient sanity check
    params_bf16 = cast_matmul_weights(params, jnp.bfloat16)
    out_bf16 = jax.block_until_ready(
        transformer_forward(params_bf16, src, nhead, compute_dtype=jnp.bfloat16))
    assert out_bf16.shape == (S, B, output_size)
    assert bool(jnp.all(jnp.isfinite(out_bf16.astype(jnp.float32))))
    assert float(jnp.max(jnp.abs(out_bf16.astype(jnp.float32) - ref))) < 0.25

    print("KERNEL_OK")
</pallas_src>

<mosaic_0001>
module attributes {stable_mosaic.version = 11 : i64} {
  func.func @_enc_pe_kernel(%arg0: i32, %arg1: memref<1x8x32xf32, #tpu.memory_space<vmem>>, %arg2: memref<32x32xf32, #tpu.memory_space<vmem>>, %arg3: memref<1x32xf32, #tpu.memory_space<vmem>>, %arg4: memref<8x32xf32, #tpu.memory_space<vmem>>, %arg5: memref<1x8x32xf32, #tpu.memory_space<vmem>>) attributes {dimension_semantics = [#tpu.dimension_semantics<parallel>], iteration_bounds = array<i64: 2>, scalar_prefetch = 0 : i64, scratch_operands = 0 : i64, tpu.core_type = #tpu.core_type<tc>, window_params = [{transform_indices = @transform_0, window_bounds = array<i64: 1, 8, 32>}, {pipeline_mode = #tpu.pipeline_mode<synchronous>, transform_indices = @transform_1, window_bounds = array<i64: 32, 32>}, {pipeline_mode = #tpu.pipeline_mode<synchronous>, transform_indices = @transform_2, window_bounds = array<i64: 1, 32>}, {pipeline_mode = #tpu.pipeline_mode<synchronous>, transform_indices = @transform_3, window_bounds = array<i64: 8, 32>}, {transform_indices = @transform_4, window_bounds = array<i64: 1, 8, 32>}]} {
    %c0 = arith.constant 0 : index
    %c0_0 = arith.constant 0 : index
    %c0_1 = arith.constant 0 : index
    %0 = vector.load %arg1[%c0, %c0_0, %c0_1] : memref<1x8x32xf32, #tpu.memory_space<vmem>>, vector<1x8x32xf32>
    %1 = vector.shape_cast %0 : vector<1x8x32xf32> to vector<8x32xf32>
    %c0_2 = arith.constant 0 : index
    %c0_3 = arith.constant 0 : index
    %2 = vector.load %arg2[%c0_2, %c0_3] : memref<32x32xf32, #tpu.memory_space<vmem>>, vector<32x32xf32>
    %cst = arith.constant dense<0.000000e+00> : vector<8x32xf32>
    %3 = tpu.matmul %1, %2, %cst {dimension_numbers = #tpu.dot_dimension_numbers<[1], [0], [0], [1], [0, 0, 1, 1], [], []>} : vector<8x32xf32>, vector<32x32xf32>, vector<8x32xf32> -> vector<8x32xf32>
    %c0_4 = arith.constant 0 : index
    %c0_5 = arith.constant 0 : index
    %4 = vector.load %arg3[%c0_4, %c0_5] : memref<1x32xf32, #tpu.memory_space<vmem>>, vector<1x32xf32>
    %5 = vector.broadcast %4 : vector<1x32xf32> to vector<8x32xf32>
    %6 = arith.addf %3, %5 : vector<8x32xf32>
    %c0_6 = arith.constant 0 : index
    %c0_7 = arith.constant 0 : index
    %7 = vector.load %arg4[%c0_6, %c0_7] : memref<8x32xf32, #tpu.memory_space<vmem>>, vector<8x32xf32>
    %8 = arith.addf %6, %7 : vector<8x32xf32>
    %c0_8 = arith.constant 0 : index
    %c0_9 = arith.constant 0 : index
    %c0_10 = arith.constant 0 : index
    %9 = vector.load %arg5[%c0_8, %c0_9, %c0_10] : memref<1x8x32xf32, #tpu.memory_space<vmem>>, vector<1x8x32xf32>
    %10 = vector.shape_cast %9 : vector<1x8x32xf32> to vector<8x32xf32>
    %11 = vector.shape_cast %8 : vector<8x32xf32> to vector<1x8x32xf32>
    tpu.vector_store %arg5[%c0_8, %c0_9, %c0_10], %11 {strides = array<i32>} : memref<1x8x32xf32, #tpu.memory_space<vmem>>, vector<1x8x32xf32>,
    return
  }
  func.func @transform_0(%arg0: i32) -> (i32, i32, i32) {
    %c0_i32 = arith.constant 0 : i32
    %c0_i32_0 = arith.constant 0 : i32
    %c0_i32_1 = arith.constant 0 : i32
    return %arg0, %c0_i32, %c0_i32_0 : i32, i32, i32
  }
  func.func @transform_1(%arg0: i32) -> (i32, i32) {
    %c0_i32 = arith.constant 0 : i32
    %c0_i32_0 = arith.constant 0 : i32
    %c0_i32_1 = arith.constant 0 : i32
    return %c0_i32, %c0_i32_0 : i32, i32
  }
  func.func @transform_2(%arg0: i32) -> (i32, i32) {
    %c0_i32 = arith.constant 0 : i32
    %c0_i32_0 = arith.constant 0 : i32
    %c0_i32_1 = arith.constant 0 : i32
    return %c0_i32, %c0_i32_0 : i32, i32
  }
  func.func @transform_3(%arg0: i32) -> (i32, i32) {
    %c0_i32 = arith.constant 0 : i32
    %c0_i32_0 = arith.constant 0 : i32
    %c0_i32_1 = arith.constant 0 : i32
    return %c0_i32, %c0_i32_0 : i32, i32
  }
  func.func @transform_4(%arg0: i32) -> (i32, i32, i32) {
    %c0_i32 = arith.constant 0 : i32
    %c0_i32_0 = arith.constant 0 : i32
    %c0_i32_1 = arith.constant 0 : i32
    return %arg0, %c0_i32, %c0_i32_0 : i32, i32, i32
  }
}

</mosaic_0001>

<bundles_post_ra>
// kernel: tpu_custom_call.1
= control target key start
LH: loop header
LB: loop body
LE: loop exit
PB: predicated region body
PF: predicated region fallthrough
CT: control target
= control target key end

     0   :  { %9 = vsyncpa [#allocation3], 0  ;;  %s876_s0 = inlined_call_operand.hbm [shape: f32[2,8,32], index: 0, kind: input, shape index: {}]   ;;  %s877_s1 = inlined_call_operand.hbm [shape: f32[32,32], index: 1, kind: input, shape index: {}]   ;;  %s878_s2 = inlined_call_operand.vmem [shape: f32[1,32], index: 2, kind: input, shape index: {}]   ;;  %s879_s3 = inlined_call_operand.vmem [shape: f32[8,32], index: 3, kind: input, shape index: {}]   ;;  %s880_s4 = inlined_call_operand.hbm [shape: f32[2,8,32], index: 4, kind: output, shape index: {}]  }
   0x1   :  { %11 = vsyncpa [#allocation3 + $0x1], 0 }
   0x2   :  { %12 = vsyncpa [#allocation6], 0 }
   0x3   :  { %13 = vsyncpa [#allocation4], 0 }
   0x4   :  { %15 = vsyncpa [#allocation4 + $0x1], 0  ;;  %s674_s15 = smov 0   ;;  %s676_s16 = smov 0  }
   0x5   :  { %s678_s17 = smov 0   ;;  %s680_s18 = smov 0  }
   0x6 LB: > { %s695_s19 = sadd.s32 4294967295, %s639_s18   ;;  %s411_s20 = sadd.s32 4294967294, %s639_s18   ;;  %s639_s18 = sphi %s680_s18, %s900_s18   ;;  %s635_s17 = sphi %s678_s17, %s899_s17   ;;  %s631_s16 = sphi %s676_s16, %s898_s16   ;;  %s627_s15 = sphi %s674_s15, %s897_s15  }
   0x7   : > { %p41_p0 = scmp.ne.s32.totalorder %s631_s16, %s627_s15  ;;  %p881_p1 = scmp.eq.s32.totalorder %s695_s19, 0 }
   0x8   : > { %p134_p3 = scmp.eq.s32.totalorder %s411_s20, 1  ;;  %p412_p5 = scmp.ge.s32.totalorder %s639_s18, 1 }
   0x9   : > { %p704_p4 = por %p881_p1, %p41_p0  ;;  %p141_p7 = scmp.lt.s32.totalorder %s639_s18, 3 }
   0xa   : > { %p709_p6 = por %p134_p3, %p41_p0  ;;  %s641_s24 = smov [#allocation5]  }
   0xb   : > { %s884_s21 = scalar_select %p704_p4, 1, 0 }
   0xc   : > { %s885_s22 = scalar_select %p709_p6, 1, 0 }
   0xd   : > { %p714_p8 = pnand %p412_p5, %p141_p7  ;;  %s153_s25 = sshll.u32 %s641_s24, 4  ;;  %s718_s25 = int_to_ptr.vmem [resolvable:$true] %s153_s25 }
   0xe   : > { %s730_s27 = sadd.s32 1, %s639_s18   ;;  %s28_s28 = sadd.s32 1, %s635_s17 }
   0xf   : > { %s886_s23 = scalar_select %p714_p8, 1, 0 }
  0x10   : > { %p457_p9 = pneg %p714_p8  ;;  %s25_s29 = ssub.s32 %s639_s18, %s730_s27 }
  0x11   : > { %s511_s6 = scalar_lea.hbm %s877_s1, 512 }
  0x12   : > { %p725_p11 = pnand %p457_p9, %p881_p1  ;;  %p512_p12 = scmp.ne.s32.totalorder %s877_s1, %s511_s6 }
  0x13   : > { %p518_p5 = scmp.lt.u32.totalorder %s511_s6, %s877_s1 }
  0x14   : > { %p513_p13 = pneg %p725_p11 }
  0x16   : > { %p514_p0 = pnand %p513_p13, %p512_p12 }
  0x18   : > { %p515_p3 = pneg %p514_p0 }
  0x1a   : > { %p520_p7 = pnand %p518_p5, %p515_p3 }
  0x1c   : > { %523 = shalt.err (!%p520_p7)
}
  0x1d   : > { %s524_s11 = scalar_lea.vmem %s718_s25, 512  ;;  %p532_p2 = scmp.lt.s32.totalorder %s718_s25, %s718_s25 }
  0x1e   : > { %p525_p9 = scmp.ne.s32.totalorder %s718_s25, %s524_s11  ;;  %p533_p6 = scmp.lt.s32.totalorder %s524_s11, %s524_s11 }
  0x20   : > { %p527_p10 = pnand %p525_p9, %p513_p13  ;;  %p534_p4 = por %p533_p6, %p532_p2 }
  0x22   : > { %p528_p1 = pneg %p527_p10 }
  0x24   : > { %p535_p8 = pnand %p534_p4, %p528_p1 }
  0x26   : > { %538 = shalt.err (!%p535_p8)
}
  0x27   : > { %s642_s12 = smov 128   ;;  %s643_s13 = smov 8  }
  0x28   : > { %460 = dma.hbm_to_vmem [thread:$0]  (!%p725_p11), %s877_s1, 512, %s718_s25, [#allocation6], %s642_s12, %s642_s12, %s643_s13  }
  0x29   : > { %p26_p2 = scmp.eq.s32.totalorder %s25_s29, 0  ;;  %p35_p1 = scmp.ne.s32.totalorder %s635_s17, %s631_s16 }
  0x2a   : > { %p36_p4 = scmp.eq.s32.totalorder %s639_s18, 0  ;;  %p470_p6 = scmp.lt.s32.totalorder %s639_s18, 2 }
  0x2b   : > { %s761_s24 = scalar_select %p26_p2, %s635_s17, %s28_s28  }
  0x2c   : > { %p37_p8 = por %p36_p4, %p35_p1  ;;  %p888_p10 = scmp.eq.s32.totalorder %s695_s19, 1 }
  0x2d   : > { %s173_s5 = sand.u32 1, %s635_s17   ;;  %s416_s6 = sshll.u32 %s639_s18, 7 }
  0x2e   : > { %p765_p12 = por %p888_p10, %p35_p1  ;;  %s415_s7 = sshll.u32 %s173_s5, 3 }
  0x2f   : > { %s774_s9 = scalar_lea.hbm %s876_s0, %s416_s6  ;;  %s177_s25 = scalar_lea.vmem [#allocation2], %s415_s7 }
  0x30   : > { %s184_s28 = sshll.u32 %s177_s25, 4  ;;  %p776_p11 = pnand %p470_p6, %p37_p8  ;;  %s780_s28 = int_to_ptr.vmem [resolvable:$true] %s184_s28 }
  0x31   : > { %s174_s10 = scalar_lea.sflag [#allocation3], %s173_s5  ;;  %s539_s11 = scalar_lea.hbm %s774_s9, 128 }
  0x32   : > { %p540_p13 = scmp.ne.s32.totalorder %s774_s9, %s539_s11  ;;  %p541_p0 = pneg %p776_p11 }
  0x33   : > { %s544_s14 = scalar_lea.hbm %s876_s0, 256  ;;  %p545_p7 = scmp.lt.u32.totalorder %s774_s9, %s876_s0 }
  0x34   : > { %p542_p3 = pnand %p541_p0, %p540_p13  ;;  %p546_p9 = scmp.lt.u32.totalorder %s544_s14, %s539_s11 }
  0x35   : > { %p548_p1 = scmp.lt.u32.totalorder %s539_s11, %s774_s9 }
  0x36   : > { %p543_p5 = pneg %p542_p3  ;;  %p547_p2 = por %p546_p9, %p545_p7 }
  0x38   : > { %p549_p4 = por %p548_p1, %p547_p2 }
  0x3a   : > { %p550_p6 = pnand %p549_p4, %p543_p5 }
  0x3c   : > { %553 = shalt.err (!%p550_p6)
}
  0x3d   : > { %s554_s5 = scalar_lea.vmem %s780_s28, 128  ;;  %s644_s7 = smov [#allocation2]  }
  0x3e   : > { %p555_p8 = scmp.ne.s32.totalorder %s780_s28, %s554_s5  ;;  %s559_s26 = sshll.u32 %s644_s7, 4  ;;  %s560_s26 = int_to_ptr.vmem [resolvable:$false] %s559_s26 }
  0x3f   : > { %s561_s8 = scalar_lea.vmem %s560_s26, 256  ;;  %p562_p3 = scmp.lt.s32.totalorder %s780_s28, %s560_s26 }
  0x40   : > { %p557_p10 = pnand %p555_p8, %p541_p0  ;;  %p563_p7 = scmp.lt.s32.totalorder %s561_s8, %s554_s5 }
  0x42   : > { %p558_p13 = pneg %p557_p10  ;;  %p564_p9 = por %p563_p7, %p562_p3 }
  0x44   : > { %p565_p2 = pnand %p564_p9, %p558_p13 }
  0x46   : > { %568 = shalt.err (!%p565_p2)
}
  0x47   : > { %464 = dma.hbm_to_vmem [thread:$0]  (!%p776_p11), %s774_s9, 128, %s780_s28, %s174_s10  }
  0x48   : > { %p891_p5 = scmp.ne.s32.totalorder %s886_s23, 0 }
  0x49   : > { %s810_s25 = sand.u32 (!%p891_p5), 1, %s631_s16   ;;  %p892_p0 = scmp.ne.s32.totalorder (!%p891_p5), %s884_s21, 0 }
  0x4a   : > { %193 = sbr.rel (%p891_p5) target bundleno = 325 (0x145), region = 36  ;;  %s418_s11 = sshll.u32 (!%p891_p5), %s810_s25, 3 }
  0x4b   : > { %s196_s12 = scalar_lea.sflag (!%p891_p5), [#allocation3], %s810_s25  ;;  %s199_s13 = scalar_lea.vmem (!%p891_p5), [#allocation2], %s418_s11 }
  0x51   : > { %614 = dma.done.wait (%p892_p0), %s196_s12, 128  }
  0x52   : > { %616 = vsyncadd (%p892_p0), %s196_s12, 4294967168  ;;  %p893_p1 = scmp.eq.s32.totalorder %s695_s19, 0 }
  0x54   : > { %618 = dma.done.wait (%p893_p1), [#allocation6], 512   ;;  %p894_p11 = pmov %p893_p1 }
  0x55   : > { %v645_v0 = vmov 0.0|0.0   ;;  %vm646_vm0 = vmmov 0   ;;  %v647_v1 = vmov 0.0   ;;  %v229_v2 = vld [vmem:[#allocation5] sm:$0xff]  ;;  %v230_v3 = vld [vmem:[#allocation5 + $0x8] sm:$0xff]  ;;  %v231_v4 = vld [vmem:[#allocation5 + $0x10] sm:$0xff] }
  0x56   : > { %620 = vsyncadd (%p894_p11), [#allocation6], 4294966784  ;;  %443 = vmatprep.subr.bf16.mxu0 %v645_v0  ;;  %440 = vmatprep.mubr.msk.f32.mxu0 %vm646_vm0, %v647_v1  ;;  %v444_v5 = vpack.c.bf16 %v230_v3, %v229_v2  ;;  %v232_v6 = vld [vmem:[#allocation5 + $0x18] sm:$0xff]  ;;  %vm240_vm1 = vcmask 261120   ;;  %v421_v9 = vld [vmem:[%s878_s2] ss:$0 sm:$0xff] }
  0x57   : > { %v447_v7 = vpack.c.bf16 %v232_v6, %v231_v4  ;;  %v228_v8 = vld [vmem:[%s199_s13] sm:$0xff]  ;;  %s424_s29 = sshll.u32 %s695_s19, 7  ;;  %s227_s10 = scalar_lea.vmem [#allocation7], %s418_s11 }
  0x58   : > { %445 = vmatpush3.bf16.msra.mxu0 %v444_v5  ;;  %v314_v11 = vld [vmem:[%s879_s3] sm:$0xff]  ;;  %s331_s14 = sshll.u32 %s227_s10, 4  ;;  %s832_s5 = scalar_lea.hbm %s880_s4, %s424_s29  ;;  %s834_s14 = int_to_ptr.vmem [resolvable:$true] %s331_s14 }
  0x59   : > { %446 = vmatprep.subr.bf16.mxu0 %v645_v0  ;;  %s318_s7 = scalar_lea.sflag [#allocation4], %s810_s25  ;;  %s569_s26 = scalar_lea.vmem %s834_s14, 128 }
  0x5a   : > { %p570_p4 = scmp.ne.s32.totalorder %s834_s14, %s569_s26  ;;  %s648_s19 = smov [#allocation7]  }
  0x5b   : > { %s573_s8 = sshll.u32 %s648_s19, 4  ;;  %s574_s8 = int_to_ptr.vmem [resolvable:$false] %s573_s8 }
  0x5c   : > { %448 = vmatpush3.bf16.msra.mxu0 %v447_v7  ;;  %p571_p6 = pnand %p570_p4, %p765_p12  ;;  %s575_s11 = scalar_lea.vmem %s574_s8, 256 }
  0x5d   : > { %p576_p10 = scmp.lt.s32.totalorder %s834_s14, %s574_s8  ;;  %p577_p13 = scmp.lt.s32.totalorder %s575_s11, %s569_s26 }
  0x5e   : > { %p572_p8 = pneg %p571_p6 }
  0x5f   : > { %441 = vmatmul.mubr.msk.f32.vlgmr.msra.gmra.mrb[0].mxu0 %vm240_vm1, %v228_v8  ;;  %p578_p3 = por %p577_p13, %p576_p10 }
  0x61   : > { %p579_p7 = pnand %p578_p3, %p572_p8 }
 0x132   : > { %v310_v10 = vpop.f32.mrb[0].mxu0 }
 0x133   : > { %v311_v12 = vadd.f32 %v421_v9, %v310_v10  ;;  %v442_v13 = vpop.f32.mrb[1].mxu0 }
 0x135   : > { %v315_v14 = vadd.f32 %v314_v11, %v311_v12 }
 0x137   : > { %316 = vst.msk [vmem:[%s227_s10] sm:$0xff] %vm240_vm1, %v315_v14 }
 0x138   : > { %582 = shalt.err (!%p579_p7)
}
 0x139   : > { %s583_s25 = scalar_lea.hbm %s832_s5, 128  ;;  %s587_s21 = scalar_lea.hbm %s880_s4, 256 }
 0x13a   : > { %p584_p9 = scmp.ne.s32.totalorder %s832_s5, %s583_s25  ;;  %p588_p0 = scmp.lt.u32.totalorder %s832_s5, %s880_s4 }
 0x13b   : > { %p589_p1 = scmp.lt.u32.totalorder %s587_s21, %s583_s25  ;;  %p591_p4 = scmp.lt.u32.totalorder %s583_s25, %s832_s5 }
 0x13c   : > { %p585_p2 = pnand %p584_p9, %p765_p12 }
 0x13d   : > { %p590_p11 = por %p589_p1, %p588_p0 }
 0x13e   : > { %p586_p5 = pneg %p585_p2 }
 0x13f   : > { %p592_p6 = por %p591_p4, %p590_p11 }
 0x141   : > { %p593_p8 = pnand %p592_p6, %p586_p5 }
 0x143   : > { %596 = shalt.err (!%p593_p8)
}
 0x144   : > { %455 = dma.vmem_to_hbm [thread:$0]  (%p765_p12), %s834_s14, 128, %s832_s5, %s318_s7  }
 0x145 PF: > { %s343_s28 = sand.u32 1, %s627_s15   ;;  %p895_p10 = scmp.ne.s32.totalorder %s885_s22, 0 }
 0x146   : > { %p896_p13 = scmp.ge.s32.totalorder %s639_s18, 2  ;;  %s344_s29 = scalar_lea.sflag [#allocation4], %s343_s28 }
 0x148   : > { %p466_p3 = pnand %p896_p13, %p895_p10 }
 0x14a   : > { %622 = dma.done.wait (!%p466_p3), %s344_s29, 128  }
 0x14b   : > { %624 = vsyncadd (!%p466_p3), %s344_s29, 4294967168  ;;  %p18_p7 = scmp.ge.s32.totalorder %s730_s27, 4   ;;  %s897_s15 = smov %s631_s16 }
 0x14c   : > { %s898_s16 = smov %s635_s17  ;;  %s899_s17 = smov %s761_s24 }
 0x14d   : > { %s900_s18 = smov %s730_s27  ;;  %20 = sbr.rel (!%p18_p7) target bundleno = 6 (0x6), region = 85 }
 0x154   :  { %349 = vsyncpa [#allocation3], 1 }
 0x155   :  { %351 = vsyncpa [#allocation3 + $0x1], 1 }
 0x156   :  { %352 = vsyncpa [#allocation6], 1 }
 0x157   :  { %353 = vsyncpa [#allocation4], 1 }
 0x158   :  { %355 = vsyncpa [#allocation4 + $0x1], 1 }

</bundles_post_ra>
